<compile_context>
chip_gen: v6e
topology: v6e:2x2x1
jax: 0.10.0
libtpu: 0.0.40
codegen_flags: <defaults>
</compile_context>

<pallas_src>
import functools

import jax
import jax.numpy as jnp
from jax.experimental import pallas as pl
from jax.experimental.pallas import tpu as pltpu

_QMAX = 127.0  # 8-bit symmetric: clamp to [-127, 127]
_EPS = 1e-8


# ---------------------------------------------------------------------------
# Kernel
# ---------------------------------------------------------------------------
def _quant_silu_kernel(*refs, use_smooth, use_quant):
    if use_smooth:
        x_ref, inv_smooth_ref, o_ref = refs
    else:
        x_ref, o_ref = refs

    x = x_ref[...].astype(jnp.float32)

    if use_smooth:
        # out = x * sigmoid(x / smooth); 1/smooth is precomputed in the wrapper
        # and broadcast (1, tl) over the token rows.
        z = x * inv_smooth_ref[...].astype(jnp.float32)
    else:
        z = x
    out = x * jax.nn.sigmoid(z)  # SiLU hot path (EUP exp + VPU mul)

    if use_quant:
        # Dynamic per-token symmetric 8-bit fake quantization (full row in-block).
        maxabs = jnp.max(jnp.abs(out), axis=-1, keepdims=True)
        scale = jnp.maximum(maxabs / _QMAX, _EPS)            # (tm, 1)
        inv_scale = pl.reciprocal(scale, approx=False)       # exact; per-row only
        q = jnp.clip(jnp.round(out * inv_scale), -_QMAX, _QMAX)
        out = q * scale

    o_ref[...] = out.astype(o_ref.dtype)


# ---------------------------------------------------------------------------
# Tile selection / wrapper
# ---------------------------------------------------------------------------
def _vmem_capacity_bytes():
    try:
        cap = int(getattr(pltpu.get_tpu_info(), "vmem_capacity_bytes", 0))
        if cap > 0:
            return cap
    except Exception:
        pass
    return 64 * 1024 * 1024  # conservative default (v7x per-TensorCore VMEM)


def _choose_tiles(num_tokens, hidden, itemsize, use_quant, vmem_cap):
    """Pick (token_tile, lane_tile) sized for VMEM and the HBM roofline."""
    # Lane tile: the quant path needs the full row in one block (per-token
    # reduction).  The plain-SiLU path can tile very wide hidden dims.
    if (not use_quant) and hidden % 128 == 0 and hidden > 2048:
        tl = 2048
        while hidden % tl:
            tl //= 2  # terminates at 128, which always divides hidden here
    else:
        tl = hidden

    # Per-row VMEM footprint: double-buffered in + out tiles (native dtype)
    # plus ~6 live f32 intermediates (x, z, sigmoid, out, |out|, q).
    bytes_per_row = tl * (4 * itemsize + 6 * 4)
    budget = min(vmem_cap // 4, 16 * 1024 * 1024)  # ~2-4 MiB input tiles: roofline plateau
    tm = max(8, (budget // max(bytes_per_row, 1)) // 8 * 8)
    tm = min(tm, 1024)
    # Keep >= 2 token grid steps when possible (v7x megacore sharding) and avoid
    # padding more than ~half the tokens for small inputs.
    tm = min(tm, max(8, ((num_tokens + 15) // 16) * 8))
    return tm, tl


def quant_silu(x, smooth=None, use_act_quant=False):
    """QuantSiLU forward.  x: (..., H) float array; smooth: None or (H,) array."""
    orig_shape = x.shape
    H = orig_shape[-1]
    x2 = x.reshape(-1, H)
    N = x2.shape[0]
    itemsize = jnp.dtype(x.dtype).itemsize
    use_smooth = smooth is not None

    vmem_cap = _vmem_capacity_bytes()
    tm, tl = _choose_tiles(N, H, itemsize, use_act_quant, vmem_cap)

    # Pad tokens to a multiple of the token tile (padded rows are zeros; SiLU(0)=0
    # and the eps-clamped quant scale keeps them finite; they're sliced off below).
    N_pad = -(-N // tm) * tm
    if N_pad != N:
        x2 = jnp.pad(x2, ((0, N_pad - N), (0, 0)))

    grid_tokens = N_pad // tm
    grid_lanes = H // tl

    inputs = [x2]
    if use_smooth:
        inv_smooth = (1.0 / jnp.asarray(smooth, jnp.float32)).reshape(1, H)
        inputs.append(inv_smooth)

    if grid_lanes > 1:
        grid = (grid_tokens, grid_lanes)
        x_spec = pl.BlockSpec((tm, tl), lambda i, j: (i, j))
        s_spec = pl.BlockSpec((1, tl), lambda i, j: (0, j))
        o_spec = pl.BlockSpec((tm, tl), lambda i, j: (i, j))
        dims = ("parallel", "parallel")
    else:
        grid = (grid_tokens,)
        x_spec = pl.BlockSpec((tm, H), lambda i: (i, 0))
        s_spec = pl.BlockSpec((1, H), lambda i: (0, 0))
        o_spec = pl.BlockSpec((tm, H), lambda i: (i, 0))
        dims = ("parallel",)

    in_specs = [x_spec] + ([s_spec] if use_smooth else [])

    # Explicit scoped-VMEM limit so the large tiles actually compile on every gen.
    need = tm * tl * (2 * itemsize * 2 + 6 * 4)
    if use_smooth:
        need += 2 * tl * 4
    vmem_limit = int(min(vmem_cap * 3 // 4, max(2 * need + (2 << 20), 32 << 20)))

    kernel = functools.partial(
        _quant_silu_kernel, use_smooth=use_smooth, use_quant=use_act_quant
    )

    out2 = pl.pallas_call(
        kernel,
        out_shape=jax.ShapeDtypeStruct((N_pad, H), x.dtype),
        grid_spec=pltpu.PrefetchScalarGridSpec(
            num_scalar_prefetch=0,
            grid=grid,
            in_specs=in_specs,
            out_specs=o_spec,
        ),
        compiler_params=pltpu.CompilerParams(
            dimension_semantics=dims,
            vmem_limit_bytes=vmem_limit,
        ),
    )(*inputs)

    if N_pad != N:
        out2 = out2[:N]
    return out2.reshape(orig_shape)


# ---------------------------------------------------------------------------
# Pure-JAX reference (mirrors the PyTorch module) + checks
# ---------------------------------------------------------------------------
def _fake_quant_ref(out_f32):
    maxabs = jnp.max(jnp.abs(out_f32), axis=-1, keepdims=True)
    scale = jnp.maximum(maxabs / _QMAX, _EPS)
    q = jnp.clip(jnp.round(out_f32 * (1.0 / scale)), -_QMAX, _QMAX)
    return q * scale, scale


def _reference(x, smooth=None, use_act_quant=False):
    xf = x.astype(jnp.float32)
    if smooth is None:
        out = xf * jax.nn.sigmoid(xf)
    else:
        out = xf * jax.nn.sigmoid(xf / jnp.asarray(smooth, jnp.float32))
    scale = None
    if use_act_quant:
        out, scale = _fake_quant_ref(out)
    return out.astype(x.dtype), scale


def _check(out, ref, quant_scale=None, atol=2e-5, rtol=2e-5):
    out = out.astype(jnp.float32)
    ref = ref.astype(jnp.float32)
    diff = jnp.abs(out - ref)
    exact = diff <= atol + rtol * jnp.abs(ref)
    if bool(jnp.all(exact)):
        return True
    if quant_scale is None:
        return False
    # Fake-quant path: tolerate extremely rare one-level flips exactly at a
    # rounding boundary (1-ulp differences between XLA and Mosaic exp/divide).
    frac_bad = float(jnp.mean(~exact))
    within_one_step = bool(jnp.all(jnp.where(exact, True, diff <= 1.05 * quant_scale)))
    return frac_bad < 2e-3 and within_one_step


if __name__ == "__main__":
    key = jax.random.PRNGKey(0)
    kx1, kx2, ks1, ks2 = jax.random.split(key, 4)

    # Small shape implied by the module (batch=2, seq=8, hidden=32).
    x_small = jax.random.normal(kx1, (2, 8, 32), jnp.float32) * 3.0
    smooth_small = 0.5 + jax.random.uniform(ks1, (32,), jnp.float32)

    # Lane-aligned hidden (multiple of 128) with a token count that does NOT
    # divide the chosen token tile -> exercises the padding path.
    x_big = jax.random.normal(kx2, (3, 5, 256), jnp.float32) * 3.0
    smooth_big = 0.5 + jax.random.uniform(ks2, (256,), jnp.float32)

    ok = True
    for x, smooth in ((x_small, smooth_small), (x_big, smooth_big)):
        for sm in (None, smooth):
            for use_q in (False, True):
                out = quant_silu(x, smooth=sm, use_act_quant=use_q)
                jax.block_until_ready(out)
                ref, scale = _reference(x, smooth=sm, use_act_quant=use_q)
                if not _check(out, ref, quant_scale=scale):
                    ok = False
                    print(
                        "MISMATCH for config:",
                        {"shape": tuple(x.shape), "smooth": sm is not None,
                         "use_act_quant": use_q},
                    )

    if ok:
        print("KERNEL_OK")
</pallas_src>

<mosaic_0001>
module attributes {stable_mosaic.version = 11 : i64} {
  func.func @_quant_silu_kernel(%arg0: i32, %arg1: memref<8x32xf32, #tpu.memory_space<vmem>>, %arg2: memref<8x32xf32, #tpu.memory_space<vmem>>) attributes {dimension_semantics = [#tpu.dimension_semantics<parallel>], iteration_bounds = array<i64: 2>, scalar_prefetch = 0 : i64, scratch_operands = 0 : i64, tpu.core_type = #tpu.core_type<tc>, window_params = [{transform_indices = @transform_0, window_bounds = array<i64: 8, 32>}, {transform_indices = @transform_1, window_bounds = array<i64: 8, 32>}]} {
    %c0 = arith.constant 0 : index
    %c0_0 = arith.constant 0 : index
    %0 = vector.load %arg1[%c0, %c0_0] : memref<8x32xf32, #tpu.memory_space<vmem>>, vector<8x32xf32>
    %1 = arith.negf %0 : vector<8x32xf32>
    %2 = math.exp %1 : vector<8x32xf32>
    %cst = arith.constant 1.000000e+00 : f32
    %3 = vector.broadcast %cst : f32 to vector<8x32xf32>
    %4 = arith.addf %3, %2 : vector<8x32xf32>
    %5 = arith.divf %3, %4 : vector<8x32xf32>
    %6 = arith.mulf %0, %5 : vector<8x32xf32>
    %c0_1 = arith.constant 0 : index
    %c0_2 = arith.constant 0 : index
    %7 = vector.load %arg2[%c0_1, %c0_2] : memref<8x32xf32, #tpu.memory_space<vmem>>, vector<8x32xf32>
    tpu.vector_store %arg2[%c0_1, %c0_2], %6 {strides = array<i32>} : memref<8x32xf32, #tpu.memory_space<vmem>>, vector<8x32xf32>,
    return
  }
  func.func @transform_0(%arg0: i32) -> (i32, i32) {
    %c0_i32 = arith.constant 0 : i32
    %c0_i32_0 = arith.constant 0 : i32
    return %arg0, %c0_i32 : i32, i32
  }
  func.func @transform_1(%arg0: i32) -> (i32, i32) {
    %c0_i32 = arith.constant 0 : i32
    %c0_i32_0 = arith.constant 0 : i32
    return %arg0, %c0_i32 : i32, i32
  }
}

</mosaic_0001>

<bundles_post_ra>
// kernel: tpu_custom_call.1
= control target key start
LH: loop header
LB: loop body
LE: loop exit
PB: predicated region body
PF: predicated region fallthrough
CT: control target
= control target key end

     0   :  { %6 = vsyncpa [#allocation3], 0  ;;  %s536_s0 = inlined_call_operand.hbm [shape: f32[16,32], index: 0, kind: input, shape index: {}]   ;;  %s537_s1 = inlined_call_operand.hbm [shape: f32[16,32], index: 1, kind: output, shape index: {}]  }
   0x1   :  { %8 = vsyncpa [#allocation3 + $0x1], 0 }
   0x2   :  { %9 = vsyncpa [#allocation4], 0 }
   0x3   :  { %11 = vsyncpa [#allocation4 + $0x1], 0  ;;  %s395_s6 = smov 0   ;;  %s397_s7 = smov 0  }
   0x4   :  { %s399_s8 = smov 0   ;;  %s401_s9 = smov 0  }
   0x5 LB: > { %s416_s10 = sadd.s32 4294967295, %s381_s9   ;;  %s226_s11 = sadd.s32 4294967294, %s381_s9   ;;  %s381_s9 = sphi %s401_s9, %s554_s9   ;;  %s377_s8 = sphi %s399_s8, %s553_s8   ;;  %s373_s7 = sphi %s397_s7, %s552_s7   ;;  %s369_s6 = sphi %s395_s6, %s551_s6  }
   0x6   : > { %s420_s12 = sadd.s32 1, %s381_s9   ;;  %s24_s13 = sadd.s32 1, %s377_s8 }
   0x7   : > { %s21_s14 = ssub.s32 %s381_s9, %s420_s12  ;;  %p31_p0 = scmp.ne.s32.totalorder %s377_s8, %s373_s7 }
   0x8   : > { %p22_p1 = scmp.eq.s32.totalorder %s21_s14, 0  ;;  %p32_p2 = scmp.eq.s32.totalorder %s381_s9, 0 }
   0x9   : > { %p37_p3 = scmp.ne.s32.totalorder %s373_s7, %s369_s6  ;;  %p38_p4 = scmp.eq.s32.totalorder %s416_s10, 0 }
   0xa   : > { %s432_s15 = scalar_select %p22_p1, %s377_s8, %s24_s13  }
   0xb   : > { %p434_p5 = por %p32_p2, %p31_p0  ;;  %p438_p6 = por %p38_p4, %p37_p3 }
   0xc   : > { %p61_p7 = scmp.eq.s32.totalorder %s416_s10, 1  ;;  %p67_p8 = scmp.eq.s32.totalorder %s226_s11, 1 }
   0xd   : > { %s541_s17 = scalar_select %p438_p6, 1, 0 }
   0xe   : > { %p251_p10 = scmp.lt.s32.totalorder %s381_s9, 2  ;;  %p445_p11 = por %p61_p7, %p31_p0 }
   0xf   : > { %p449_p12 = por %p67_p8, %p37_p3  ;;  %s87_s20 = sand.u32 1, %s377_s8  }
  0x10   : > { %s542_s18 = scalar_select %p445_p11, 1, 0 }
  0x11   : > { %s543_s19 = scalar_select %p449_p12, 1, 0 }
  0x12   : > { %s230_s21 = sshll.u32 %s381_s9, 7  ;;  %s229_s22 = sshll.u32 %s87_s20, 3 }
  0x13   : > { %s458_s25 = scalar_lea.hbm %s536_s0, %s230_s21  ;;  %s91_s26 = scalar_lea.vmem [#allocation2], %s229_s22 }
  0x14   : > { %s98_s27 = sshll.u32 %s91_s26, 4  ;;  %p462_p13 = pnand %p251_p10, %p434_p5  ;;  %s466_s27 = int_to_ptr.vmem [resolvable:$true] %s98_s27 }
  0x15   : > { %s88_s29 = scalar_lea.sflag [#allocation3], %s87_s20  ;;  %s289_s30 = scalar_lea.hbm %s458_s25, 128 }
  0x16   : > { %p290_p2 = scmp.ne.s32.totalorder %s458_s25, %s289_s30  ;;  %p291_p3 = pneg %p462_p13 }
  0x17   : > { %s294_s4 = scalar_lea.hbm %s536_s0, 256  ;;  %p295_p5 = scmp.lt.s32.totalorder %s458_s25, %s536_s0 }
  0x18   : > { %p292_p4 = pnand %p291_p3, %p290_p2  ;;  %p296_p8 = scmp.lt.s32.totalorder %s294_s4, %s289_s30 }
  0x1a   : > { %p293_p7 = pneg %p292_p4  ;;  %p297_p10 = por %p296_p8, %p295_p5 }
  0x1c   : > { %p298_p9 = pnand %p297_p10, %p293_p7 }
  0x1e   : > { %301 = shalt.err (!%p298_p9)
}
  0x1f   : > { %s302_s13 = scalar_lea.vmem %s466_s27, 128  ;;  %s383_s14 = smov [#allocation2]  }
  0x20   : > { %p303_p0 = scmp.ne.s32.totalorder %s466_s27, %s302_s13  ;;  %s307_s16 = sshll.u32 %s383_s14, 4  ;;  %s308_s16 = int_to_ptr.vmem [resolvable:$false] %s307_s16 }
  0x21   : > { %s309_s20 = scalar_lea.vmem %s308_s16, 256  ;;  %p310_p4 = scmp.lt.s32.totalorder %s466_s27, %s308_s16 }
  0x22   : > { %p305_p1 = pnand %p303_p0, %p291_p3  ;;  %p311_p12 = scmp.lt.s32.totalorder %s309_s20, %s302_s13 }
  0x24   : > { %p306_p2 = pneg %p305_p1  ;;  %p312_p11 = por %p311_p12, %p310_p4 }
  0x26   : > { %p313_p6 = pnand %p312_p11, %p306_p2 }
  0x28   : > { %316 = shalt.err (!%p313_p6)
}
  0x29   : > { %246 = dma.hbm_to_vmem [thread:$0]  (!%p462_p13), %s458_s25, 128, %s466_s27, %s88_s29  }
  0x2a   : > { %p545_p9 = scmp.lt.s32.totalorder %s381_s9, 3  ;;  %p546_p7 = scmp.ge.s32.totalorder %s381_s9, 1 }
  0x2c   : > { %p104_p0 = pnand %p546_p7, %p545_p9 }
  0x2d   : > { %s493_s21 = sand.u32 (!%p104_p0), 1, %s373_s7   ;;  %p547_p6 = scmp.ne.s32.totalorder (!%p104_p0), %s541_s17, 0 }
  0x2e   : > { %107 = sbr.rel (%p104_p0) target bundleno = 100 (0x64), region = 24  ;;  %s232_s22 = sshll.u32 (!%p104_p0), %s493_s21, 3 }
  0x2f   : > { %s110_s23 = scalar_lea.sflag (!%p104_p0), [#allocation3], %s493_s21  ;;  %s113_s24 = scalar_lea.vmem (!%p104_p0), [#allocation2], %s232_s22 }
  0x33   : > { %360 = dma.done.wait (%p547_p6), %s110_s23, 128  }
  0x34   : > { %362 = vsyncadd (%p547_p6), %s110_s23, 4294967168  ;;  %v132_v0 = vld [vmem:[%s113_s24] sm:$0xff]  ;;  %s131_s25 = scalar_lea.vmem [#allocation5], %s232_s22  ;;  %s236_s27 = sshll.u32 %s416_s10, 7  ;;  %vm140_vm0 = vcmask 261120  }
  0x35   : > { %v234_v1 = vmul.f32 -1.442695, %v132_v0  ;;  %s156_s26 = sshll.u32 %s131_s25, 4  ;;  %s154_s17 = scalar_lea.hbm %s537_s1, %s236_s27  ;;  %s157_s26 = int_to_ptr.vmem [resolvable:$true] %s156_s26 }
  0x36   : > { %s143_s30 = scalar_lea.sflag [#allocation4], %s493_s21  ;;  %s317_s2 = scalar_lea.vmem %s157_s26, 128 }
  0x37   : > { %285 = vpow2.f32 %v234_v1  ;;  %p318_p11 = scmp.ne.s32.totalorder %s157_s26, %s317_s2  ;;  %p548_p12 = scmp.ne.s32.totalorder %s542_s18, 0 }
  0x38   : > { %s384_s3 = smov [#allocation5]  }
  0x39   : > { %p319_p13 = pnand %p318_p11, %p548_p12  ;;  %s321_s4 = sshll.u32 %s384_s3, 4  ;;  %s322_s4 = int_to_ptr.vmem [resolvable:$false] %s321_s4 }
  0x3a   : > { %s323_s5 = scalar_lea.vmem %s322_s4, 256  ;;  %p324_p3 = scmp.lt.s32.totalorder %s157_s26, %s322_s4 }
  0x3b   : > { %p320_p1 = pneg %p319_p13  ;;  %p325_p5 = scmp.lt.s32.totalorder %s323_s5, %s317_s2 }
  0x3d   : > { %p326_p8 = por %p325_p5, %p324_p3 }
  0x3f   : > { %p327_p10 = pnand %p326_p8, %p320_p1 }
  0x44   : > { %v286_v2 = vpop.eup %285 }
  0x45   : > { %v136_v3 = vadd.f32 1.0, %v286_v2 }
  0x47   : > { %287 = vrcp.f32 %v136_v3 }
  0x54   : > { %v288_v4 = vpop.eup %287 }
  0x55   : > { %v139_v5 = vmul.f32 %v288_v4, %v132_v0 }
  0x57   : > { %141 = vst.msk [vmem:[%s131_s25] sm:$0xff] %vm140_vm0, %v139_v5 }
  0x58   : > { %330 = shalt.err (!%p327_p10)
}
  0x59   : > { %s331_s10 = scalar_lea.hbm %s154_s17, 128  ;;  %s335_s14 = scalar_lea.hbm %s537_s1, 256 }
  0x5a   : > { %p332_p2 = scmp.ne.s32.totalorder %s154_s17, %s331_s10  ;;  %p336_p7 = scmp.lt.s32.totalorder %s154_s17, %s537_s1 }
  0x5b   : > { %p337_p0 = scmp.lt.s32.totalorder %s335_s14, %s331_s10 }
  0x5c   : > { %p333_p4 = pnand %p332_p2, %p548_p12 }
  0x5d   : > { %p338_p6 = por %p337_p0, %p336_p7 }
  0x5e   : > { %p334_p9 = pneg %p333_p4 }
  0x60   : > { %p339_p11 = pnand %p338_p6, %p334_p9 }
  0x62   : > { %342 = shalt.err (!%p339_p11)
}
  0x63   : > { %241 = dma.vmem_to_hbm [thread:$0]  (%p548_p12), %s157_s26, 128, %s154_s17, %s143_s30  }
  0x64 PF: > { %s168_s21 = sand.u32 1, %s369_s6   ;;  %p549_p13 = scmp.ne.s32.totalorder %s543_s19, 0 }
  0x65   : > { %p550_p1 = scmp.ge.s32.totalorder %s381_s9, 2  ;;  %s169_s22 = scalar_lea.sflag [#allocation4], %s168_s21 }
  0x67   : > { %p248_p3 = pnand %p550_p1, %p549_p13 }
  0x69   : > { %p249_p5 = pneg %p248_p3 }
  0x6b   : > { %364 = dma.done.wait (%p249_p5), %s169_s22, 128  }
  0x6c   : > { %366 = vsyncadd (%p249_p5), %s169_s22, 4294967168  ;;  %p14_p8 = scmp.ge.s32.totalorder %s420_s12, 4   ;;  %s551_s6 = smov %s373_s7 }
  0x6d   : > { %s552_s7 = smov %s377_s8  ;;  %s553_s8 = smov %s432_s15 }
  0x6e   : > { %s554_s9 = smov %s420_s12  ;;  %16 = sbr.rel (!%p14_p8) target bundleno = 5 (0x5), region = 69 }
  0x73   :  { %174 = vsyncpa [#allocation3], 1 }
  0x74   :  { %176 = vsyncpa [#allocation3 + $0x1], 1 }
  0x75   :  { %177 = vsyncpa [#allocation4], 1 }
  0x76   :  { %179 = vsyncpa [#allocation4 + $0x1], 1 }

</bundles_post_ra>
